<compile_context>
chip_gen: v5e
topology: v5e:2x2
jax: 0.10.0
libtpu: 0.0.40
codegen_flags: <defaults>
</compile_context>

<pallas_src>
import functools

import jax
import jax.numpy as jnp
import numpy as np
from jax.experimental import pallas as pl
from jax.experimental.pallas import tpu as pltpu


_NEG = -1e30  # finite "minus infinity" for max-pool init / window masking


def _round_up(x, m):
    return ((x + m - 1) // m) * m


# ---------------- kernel 1: fused gated conv + global max-pool -------------- #
def conv_pool_kernel(x_ref, w_ref, b_ref, pooled_ref, *, bm, tk, t, t_pad):
    kt = pl.program_id(1)

    @pl.when(kt == 0)
    def _():
        pooled_ref[...] = jnp.full_like(pooled_ref, _NEG)

    kp = x_ref.shape[-1]
    x = x_ref[...].reshape(bm * tk, kp)                         # (M, Kp) bf16

    # Both convs in one MXU matmul: cols 0:128 = conv1, 128:256 = conv2.
    conv = jnp.dot(x, w_ref[...], preferred_element_type=jnp.float32)
    conv = conv + b_ref[...]                                    # (M, 256) f32

    gated = jnp.maximum(conv[:, 0:128], 0.0) * jax.nn.sigmoid(conv[:, 128:256])
    gated = gated.reshape(bm, tk, 128)                          # (BM, TK, 128)

    if t_pad != t:  # mask zero-padded trailing windows (static branch)
        t_idx = jax.lax.broadcasted_iota(jnp.int32, (bm, tk, 128), 1) + kt * tk
        gated = jnp.where(t_idx < t, gated, _NEG)

    # Running global max-pool over the window (T) axis.
    pooled_ref[...] = jnp.maximum(pooled_ref[...], jnp.max(gated, axis=1))


# ---------------------- kernel 2: batched FC head (tiny) -------------------- #
def fc_head_kernel(p_ref, f1w_ref, f1b_ref, f2w_ref, f2b_ref, out_ref):
    h = jnp.dot(p_ref[...], f1w_ref[...], preferred_element_type=jnp.float32)
    h = jnp.maximum(h + f1b_ref[...], 0.0)                      # fc1 + relu
    y = jnp.dot(h, f2w_ref[...], preferred_element_type=jnp.float32) + f2b_ref[...]
    out_ref[...] = jax.nn.sigmoid(y)                            # fc2 + sigmoid


# --------------------------------- wrapper ---------------------------------- #
def malconv_forward(x_tokens, params, window_size):
    """x_tokens: (B, L) int32 byte values in [0, 255]."""
    W = window_size
    B, L = x_tokens.shape
    T = L // W                       # Conv1d(stride=W) drops any partial window
    assert T >= 1
    x_tokens = x_tokens[:, : T * W]

    # ---- tile sizing (scales from the toy demo to real MalConv shapes) ----
    K = 8 * W
    Kp = _round_up(K, 128)                        # lane-aligned contraction dim
    TK = 256 if T >= 256 else _round_up(T, 8)     # windows per grid step
    T_pad = _round_up(T, TK)
    nt = T_pad // TK
    BM = max(1, min(B, 256 // TK))                # fuse batch rows into the M tile
    B_pad = _round_up(B, BM)
    nb = B_pad // BM

    # ---- glue: embedding gather in natural (B, T, W*8) layout, bf16 ----
    emb = params["embed"].astype(jnp.bfloat16)[x_tokens]        # (B, T*W, 8)
    xw = emb.reshape(B, T, K)                                   # no transpose pass
    pad = ((0, B_pad - B), (0, T_pad - T), (0, Kp - K))
    if any(p[1] for p in pad):
        xw = jnp.pad(xw, pad)

    # ---- interleaved conv weight (Kp, 256): cols 0:128 conv1, 128:256 conv2 ----
    wc = jnp.zeros((W, 8, 256), jnp.float32)
    wc = wc.at[:, 0:4, 0:128].set(jnp.transpose(params["conv1_w"], (2, 1, 0)))
    wc = wc.at[:, 4:8, 128:256].set(jnp.transpose(params["conv2_w"], (2, 1, 0)))
    wc = wc.reshape(K, 256)
    if Kp != K:
        wc = jnp.pad(wc, ((0, Kp - K), (0, 0)))
    wc = wc.astype(jnp.bfloat16)
    bc = jnp.concatenate([params["conv1_b"], params["conv2_b"]]).reshape(1, 256)

    pooled = pl.pallas_call(
        functools.partial(conv_pool_kernel, bm=BM, tk=TK, t=T, t_pad=T_pad),
        out_shape=jax.ShapeDtypeStruct((B_pad, 128), jnp.float32),
        grid_spec=pltpu.PrefetchScalarGridSpec(
            num_scalar_prefetch=0,
            grid=(nb, nt),
            in_specs=[
                pl.BlockSpec((BM, TK, Kp), lambda ib, kt: (ib, kt, 0)),  # windows
                pl.BlockSpec((Kp, 256), lambda ib, kt: (0, 0)),          # conv w
                pl.BlockSpec((1, 256), lambda ib, kt: (0, 0)),           # conv b
            ],
            out_specs=pl.BlockSpec((BM, 128), lambda ib, kt: (ib, 0)),   # pooled
        ),
        compiler_params=pltpu.CompilerParams(
            dimension_semantics=("parallel", "arbitrary")),
    )(xw, wc, bc)

    # ---- tiny batched FC head on the lane-dense pooled output (f32) ----
    f1w = params["fc1_w"].T                                     # (128, 128)
    f1b = params["fc1_b"].reshape(1, 128)
    f2w = params["fc2_w"].T                                     # (128, 2)
    f2b = params["fc2_b"].reshape(1, 2)
    out = pl.pallas_call(
        fc_head_kernel,
        out_shape=jax.ShapeDtypeStruct((B_pad, 2), jnp.float32),
    )(pooled, f1w, f1b, f2w, f2b)
    # TODO(synk): dropout is a no-op in eval-mode forward and is omitted.
    return out[:B]


# --------------------------- pure-JAX reference ------------------------------ #
def malconv_reference(x_tokens, params, window_size):
    W = window_size
    emb = params["embed"][x_tokens]                    # (B, L, 8) f32
    emb = jnp.transpose(emb, (0, 2, 1))                # (B, 8, L)

    def conv1d(xc, w, b):
        out = jax.lax.conv_general_dilated(
            xc, w, window_strides=(W,), padding="VALID",
            dimension_numbers=("NCH", "OIH", "NCH"))
        return out + b[None, :, None]

    c1 = conv1d(emb[:, 0:4, :], params["conv1_w"], params["conv1_b"])
    c2 = conv1d(emb[:, 4:8, :], params["conv2_w"], params["conv2_b"])
    h = jax.nn.relu(c1) * jax.nn.sigmoid(c2)           # (B, 128, T)
    p = jnp.max(h, axis=-1)                            # (B, 128)
    h1 = jax.nn.relu(p @ params["fc1_w"].T + params["fc1_b"])
    return jax.nn.sigmoid(h1 @ params["fc2_w"].T + params["fc2_b"])


# ------------------------------- param init ---------------------------------- #
def init_params(key, window_size):
    W = window_size
    ks = jax.random.split(key, 9)
    u = lambda k, shape, bound: jax.random.uniform(
        k, shape, jnp.float32, -bound, bound)

    embed = jax.random.normal(ks[0], (256, 8), jnp.float32)
    embed = embed.at[0].set(0.0)                       # padding_idx=0

    fan_conv = 4 * W
    return {
        "embed":   embed,
        "conv1_w": u(ks[1], (128, 4, W), 1.0 / np.sqrt(fan_conv)),
        "conv1_b": u(ks[2], (128,),      1.0 / np.sqrt(fan_conv)),
        "conv2_w": u(ks[3], (128, 4, W), 1.0 / np.sqrt(fan_conv)),
        "conv2_b": u(ks[4], (128,),      1.0 / np.sqrt(fan_conv)),
        "fc1_w":   u(ks[5], (128, 128),  1.0 / np.sqrt(128)),
        "fc1_b":   u(ks[6], (128,),      1.0 / np.sqrt(128)),
        "fc2_w":   u(ks[7], (2, 128),    1.0 / np.sqrt(128)),
        "fc2_b":   u(ks[8], (2,),        1.0 / np.sqrt(128)),
    }


# ----------------------------------- main ------------------------------------ #
if __name__ == "__main__":
    # Small, consistent shapes: input_length=256, window_size=32 -> T=8 windows.
    B, INPUT_LENGTH, WINDOW_SIZE = 2, 256, 32

    key = jax.random.PRNGKey(0)
    k_params, k_x = jax.random.split(key)
    params = init_params(k_params, WINDOW_SIZE)

    x = jax.random.randint(k_x, (B, INPUT_LENGTH), 0, 256, dtype=jnp.int32)

    out = jax.block_until_ready(malconv_forward(x, params, WINDOW_SIZE))
    ref = jax.block_until_ready(malconv_reference(x, params, WINDOW_SIZE))

    # bf16 matmul operands -> compare against f32 reference with loose tolerance.
    np.testing.assert_allclose(np.asarray(out), np.asarray(ref),
                               rtol=2e-2, atol=2e-2)
    print("KERNEL_OK")
</pallas_src>

<mosaic_0001>
module attributes {stable_mosaic.version = 11 : i64} {
  func.func @conv_pool_kernel(%arg0: i32, %arg1: i32, %arg2: memref<2x8x256xbf16, #tpu.memory_space<vmem>>, %arg3: memref<256x256xbf16, #tpu.memory_space<vmem>>, %arg4: memref<1x256xf32, #tpu.memory_space<vmem>>, %arg5: memref<2x128xf32, #tpu.memory_space<vmem>>) attributes {dimension_semantics = [#tpu.dimension_semantics<parallel>, #tpu.dimension_semantics<arbitrary>], iteration_bounds = array<i64: 1, 1>, scalar_prefetch = 0 : i64, scratch_operands = 0 : i64, tpu.core_type = #tpu.core_type<tc>, window_params = [{transform_indices = @transform_0, window_bounds = array<i64: 2, 8, 256>}, {pipeline_mode = #tpu.pipeline_mode<synchronous>, transform_indices = @transform_1, window_bounds = array<i64: 256, 256>}, {pipeline_mode = #tpu.pipeline_mode<synchronous>, transform_indices = @transform_2, window_bounds = array<i64: 1, 256>}, {transform_indices = @transform_3, window_bounds = array<i64: 2, 128>}]} {
    %c0_i32 = arith.constant 0 : i32
    %0 = arith.cmpi eq, %arg1, %c0_i32 : i32
    %1 = arith.extui %0 : i1 to i32
    %c0_i32_0 = arith.constant 0 : i32
    %2 = arith.cmpi ne, %1, %c0_i32_0 : i32
    scf.if %2 {
      %cst_14 = arith.constant -1.000000e+30 : f32
      %25 = vector.broadcast %cst_14 : f32 to vector<2x128xf32>
      %c0_15 = arith.constant 0 : index
      %c0_16 = arith.constant 0 : index
      %26 = vector.load %arg5[%c0_15, %c0_16] : memref<2x128xf32, #tpu.memory_space<vmem>>, vector<2x128xf32>
      tpu.vector_store %arg5[%c0_15, %c0_16], %25 {strides = array<i32>} : memref<2x128xf32, #tpu.memory_space<vmem>>, vector<2x128xf32>,
    } else {
    }
    %c0 = arith.constant 0 : index
    %c0_1 = arith.constant 0 : index
    %c0_2 = arith.constant 0 : index
    %3 = vector.load %arg2[%c0, %c0_1, %c0_2] : memref<2x8x256xbf16, #tpu.memory_space<vmem>>, vector<2x8x256xbf16>
    %4 = vector.shape_cast %3 : vector<2x8x256xbf16> to vector<16x256xbf16>
    %c0_3 = arith.constant 0 : index
    %c0_4 = arith.constant 0 : index
    %5 = vector.load %arg3[%c0_3, %c0_4] : memref<256x256xbf16, #tpu.memory_space<vmem>>, vector<256x256xbf16>
    %cst = arith.constant dense<0.000000e+00> : vector<16x256xf32>
    %6 = tpu.matmul %4, %5, %cst {dimension_numbers = #tpu.dot_dimension_numbers<[1], [0], [0], [1], [0, 0, 1, 1], [], []>} : vector<16x256xbf16>, vector<256x256xbf16>, vector<16x256xf32> -> vector<16x256xf32>
    %c0_5 = arith.constant 0 : index
    %c0_6 = arith.constant 0 : index
    %7 = vector.load %arg4[%c0_5, %c0_6] : memref<1x256xf32, #tpu.memory_space<vmem>>, vector<1x256xf32>
    %8 = vector.broadcast %7 : vector<1x256xf32> to vector<16x256xf32>
    %9 = arith.addf %6, %8 : vector<16x256xf32>
    %10 = vector.extract_strided_slice %9 {offsets = [0, 0], sizes = [16, 128], strides = [1, 1]} : vector<16x256xf32> to vector<16x128xf32>
    %cst_7 = arith.constant 0.000000e+00 : f32
    %11 = vector.broadcast %cst_7 : f32 to vector<16x128xf32>
    %12 = arith.maximumf %10, %11 : vector<16x128xf32>
    %13 = vector.extract_strided_slice %9 {offsets = [0, 128], sizes = [16, 128], strides = [1, 1]} : vector<16x256xf32> to vector<16x128xf32>
    %14 = arith.negf %13 : vector<16x128xf32>
    %15 = math.exp %14 : vector<16x128xf32>
    %cst_8 = arith.constant 1.000000e+00 : f32
    %16 = vector.broadcast %cst_8 : f32 to vector<16x128xf32>
    %17 = arith.addf %16, %15 : vector<16x128xf32>
    %18 = arith.divf %16, %17 : vector<16x128xf32>
    %19 = arith.mulf %12, %18 : vector<16x128xf32>
    %20 = vector.shape_cast %19 : vector<16x128xf32> to vector<2x8x128xf32>
    %c0_9 = arith.constant 0 : index
    %c0_10 = arith.constant 0 : index
    %21 = vector.load %arg5[%c0_9, %c0_10] : memref<2x128xf32, #tpu.memory_space<vmem>>, vector<2x128xf32>
    %cst_11 = arith.constant dense<0xFF800000> : vector<2x128xf32>
    %22 = vector.multi_reduction <maximumf>, %20, %cst_11 [1] : vector<2x8x128xf32> to vector<2x128xf32>
    %23 = arith.maximumf %21, %22 : vector<2x128xf32>
    %c0_12 = arith.constant 0 : index
    %c0_13 = arith.constant 0 : index
    %24 = vector.load %arg5[%c0_12, %c0_13] : memref<2x128xf32, #tpu.memory_space<vmem>>, vector<2x128xf32>
    tpu.vector_store %arg5[%c0_12, %c0_13], %23 {strides = array<i32>} : memref<2x128xf32, #tpu.memory_space<vmem>>, vector<2x128xf32>,
    return
  }
  func.func @transform_0(%arg0: i32, %arg1: i32) -> (i32, i32, i32) {
    %c0_i32 = arith.constant 0 : i32
    %c0_i32_0 = arith.constant 0 : i32
    return %arg0, %arg1, %c0_i32 : i32, i32, i32
  }
  func.func @transform_1(%arg0: i32, %arg1: i32) -> (i32, i32) {
    %c0_i32 = arith.constant 0 : i32
    %c0_i32_0 = arith.constant 0 : i32
    %c0_i32_1 = arith.constant 0 : i32
    return %c0_i32, %c0_i32_0 : i32, i32
  }
  func.func @transform_2(%arg0: i32, %arg1: i32) -> (i32, i32) {
    %c0_i32 = arith.constant 0 : i32
    %c0_i32_0 = arith.constant 0 : i32
    %c0_i32_1 = arith.constant 0 : i32
    return %c0_i32, %c0_i32_0 : i32, i32
  }
  func.func @transform_3(%arg0: i32, %arg1: i32) -> (i32, i32) {
    %c0_i32 = arith.constant 0 : i32
    %c0_i32_0 = arith.constant 0 : i32
    return %arg0, %c0_i32 : i32, i32
  }
}

</mosaic_0001>

<bundles_post_ra>
// kernel: tpu_custom_call.1
= control target key start
LH: loop header
LB: loop body
LE: loop exit
PB: predicated region body
PF: predicated region fallthrough
CT: control target
= control target key end

     0   :  { %8 = vsyncpa [#allocation3], 0  ;;  %s739_s0 = inlined_call_operand.hbm [shape: bf16[2,8,256], index: 0, kind: input, shape index: {}]   ;;  %s740_s1 = inlined_call_operand.hbm [shape: bf16[256,256], index: 1, kind: input, shape index: {}]   ;;  %s741_s2 = inlined_call_operand.hbm [shape: f32[1,256], index: 2, kind: input, shape index: {}]   ;;  %s742_s3 = inlined_call_operand.hbm [shape: f32[2,128], index: 3, kind: output, shape index: {}]  }
   0x1   :  { %9 = vsyncpa [#allocation6], 0 }
   0x2   :  { %10 = vsyncpa [#allocation4], 0  ;;  %s28_s14 = sshll.u32 %s740_s1, 4  ;;  %s700_s15 = smov [#allocation5]   ;;  %s29_s14 = int_to_ptr.hbm [resolvable:$true] %s28_s14 }
   0x3   :  { %s30_s16 = sshll.u32 %s700_s15, 4  ;;  %s15_s19 = sshll.u32 %s739_s0, 4  ;;  %s31_s16 = int_to_ptr.vmem [resolvable:$true] %s30_s16  ;;  %s16_s19 = int_to_ptr.hbm [resolvable:$true] %s15_s19 }
   0x4   :  { %s701_s20 = smov 128   ;;  %s702_s21 = smov 8  }
   0x5   :  { %36 = dma.hbm_to_vmem [thread:$0]  %s29_s14, 4096, %s31_s16, [#allocation6], %s701_s20, %s701_s20, %s702_s21  }
   0x6   :  { %s703_s22 = smov [#allocation2]   ;;  %s42_s26 = sshll.u32 %s741_s2, 4  ;;  %s43_s26 = int_to_ptr.hbm [resolvable:$true] %s42_s26 }
   0x7   :  { %s17_s23 = sshll.u32 %s703_s22, 4  ;;  %s704_s1 = smov [#allocation7]   ;;  %s18_s23 = int_to_ptr.vmem [resolvable:$true] %s17_s23 }
   0x8   :  { %23 = dma.hbm_to_vmem [thread:$0]  %s16_s19, 256, %s18_s23, [#allocation3], %s701_s20, %s701_s20, %s702_s21  }
   0x9   :  { %s44_s27 = sshll.u32 %s704_s1, 4  ;;  %s45_s27 = int_to_ptr.vmem [resolvable:$true] %s44_s27 }
   0xa   :  { %47 = dma.hbm_to_vmem [thread:$0]  %s43_s26, 32, %s45_s27, [#allocation6]  }
   0xb   :  { %694 = dma.done.wait [#allocation3], 256  }
   0xc   :  { %695 = vsyncadd [#allocation3], 4294967040 }
   0xd   :  { %696 = dma.done.wait [#allocation6], 4128  }
   0xe   :  { %697 = vsyncadd [#allocation6], 4294963168  ;;  %v565_v0 = vld [vmem:[#allocation5 + $0x74] sm:$0xf]  ;;  %v479_v1 = vld [vmem:[#allocation5 + $0x78] sm:$0xf0] }
   0xf   :  { %v581_v2 = vld [vmem:[#allocation5 + $0xf4] sm:$0xf]  ;;  %v482_v3 = vor.u32 %v565_v0, %v479_v1  ;;  %v543_v4 = vld [vmem:[#allocation5 + $0xf8] sm:$0xf0]  ;;  %v563_v5 = vld [vmem:[#allocation5 + $0x64] sm:$0xf] }
  0x10   :  { %v471_v6 = vld [vmem:[#allocation5 + $0x68] sm:$0xf0]  ;;  %v546_v7 = vor.u32 %v581_v2, %v543_v4  ;;  %v579_v8 = vld [vmem:[#allocation5 + $0xe4] sm:$0xf]  ;;  %v561_v12 = vld [vmem:[#allocation5 + $0x54] sm:$0xf] }
  0x11   :  { %v535_v9 = vld [vmem:[#allocation5 + $0xe8] sm:$0xf0]  ;;  %303 = vmatpush.bf16.msra.mxu2 %v482_v3  ;;  %v474_v10 = vor.u32 %v563_v5, %v471_v6  ;;  %v463_v13 = vld [vmem:[#allocation5 + $0x58] sm:$0xf0]  ;;  %v577_v14 = vld [vmem:[#allocation5 + $0xd4] sm:$0xf] }
  0x12   :  { %317 = vmatpush.bf16.msra.mxu3 %v546_v7  ;;  %v538_v11 = vor.u32 %v579_v8, %v535_v9  ;;  %v527_v15 = vld [vmem:[#allocation5 + $0xd8] sm:$0xf0]  ;;  %v466_v16 = vor.u32 %v561_v12, %v463_v13  ;;  %v559_v17 = vld [vmem:[#allocation5 + $0x44] sm:$0xf]  ;;  %v455_v19 = vld [vmem:[#allocation5 + $0x48] sm:$0xf0] }
  0x13   :  { %v530_v18 = vor.u32 %v577_v14, %v527_v15  ;;  %v477_v20 = vld [vmem:[#allocation5 + $0x70] sm:$0xf]  ;;  %v566_v21 = vld [vmem:[#allocation5 + $0x74] sm:$0xf0]  ;;  %v575_v22 = vld [vmem:[#allocation5 + $0xc4] sm:$0xf]  ;;  %v458_v28 = vor.u32 %v559_v17, %v455_v19 }
  0x14   :  { %v519_v23 = vld [vmem:[#allocation5 + $0xc8] sm:$0xf0]  ;;  %v478_v24 = vor.u32 %v566_v21, %v477_v20  ;;  %v541_v25 = vld [vmem:[#allocation5 + $0xf0] sm:$0xf]  ;;  %v582_v26 = vld [vmem:[#allocation5 + $0xf4] sm:$0xf0] }
  0x15   :  { %304 = vmatpush.bf16.msra.mxu2 %v474_v10  ;;  %v469_v27 = vld [vmem:[#allocation5 + $0x60] sm:$0xf]  ;;  %v542_v29 = vor.u32 %v582_v26, %v541_v25  ;;  %v564_v30 = vld [vmem:[#allocation5 + $0x64] sm:$0xf0]  ;;  %v522_v31 = vor.u32 %v575_v22, %v519_v23  ;;  %v557_v32 = vld [vmem:[#allocation5 + $0x34] sm:$0xf] }
  0x16   :  { %318 = vmatpush.bf16.msra.mxu3 %v538_v11  ;;  %275 = vmatpush.bf16.msra.mxu0 %v478_v24  ;;  %v447_v33 = vld [vmem:[#allocation5 + $0x38] sm:$0xf0]  ;;  %v470_v34 = vor.u32 %v564_v30, %v469_v27  ;;  %v533_v35 = vld [vmem:[#allocation5 + $0xe0] sm:$0xf]  ;;  %v573_v36 = vld [vmem:[#allocation5 + $0xb4] sm:$0xf] }
  0x17   :  { %v511_v37 = vld [vmem:[#allocation5 + $0xb8] sm:$0xf0]  ;;  %289 = vmatpush.bf16.msra.mxu1 %v542_v29  ;;  %v580_v38 = vld [vmem:[#allocation5 + $0xe4] sm:$0xf0]  ;;  %v555_v39 = vld [vmem:[#allocation5 + $0x24] sm:$0xf]  ;;  %v450_v42 = vor.u32 %v557_v32, %v447_v33 }
  0x18   :  { %v534_v40 = vor.u32 %v580_v38, %v533_v35  ;;  %v461_v41 = vld [vmem:[#allocation5 + $0x50] sm:$0xf]  ;;  %v562_v43 = vld [vmem:[#allocation5 + $0x54] sm:$0xf0]  ;;  %v514_v46 = vor.u32 %v573_v36, %v511_v37  ;;  %v439_v47 = vld [vmem:[#allocation5 + $0x28] sm:$0xf0] }
  0x19   :  { %305 = vmatpush.bf16.msra.mxu2 %v466_v16  ;;  %v525_v44 = vld [vmem:[#allocation5 + $0xd0] sm:$0xf]  ;;  %v578_v45 = vld [vmem:[#allocation5 + $0xd4] sm:$0xf0]  ;;  %v462_v48 = vor.u32 %v562_v43, %v461_v41  ;;  %v453_v49 = vld [vmem:[#allocation5 + $0x40] sm:$0xf]  ;;  %v442_v56 = vor.u32 %v555_v39, %v439_v47 }
  0x1a   :  { %319 = vmatpush.bf16.msra.mxu3 %v530_v18  ;;  %276 = vmatpush.bf16.msra.mxu0 %v470_v34  ;;  %v560_v50 = vld [vmem:[#allocation5 + $0x44] sm:$0xf0]  ;;  %v571_v51 = vld [vmem:[#allocation5 + $0xa4] sm:$0xf]  ;;  %v503_v52 = vld [vmem:[#allocation5 + $0xa8] sm:$0xf0]  ;;  %v526_v53 = vor.u32 %v578_v45, %v525_v44 }
  0x1b   :  { %290 = vmatpush.bf16.msra.mxu1 %v534_v40  ;;  %v517_v54 = vld [vmem:[#allocation5 + $0xc0] sm:$0xf]  ;;  %v576_v55 = vld [vmem:[#allocation5 + $0xc4] sm:$0xf0]  ;;  %v553_v57 = vld [vmem:[#allocation5 + $0x14] sm:$0xf]  ;;  %v454_v58 = vor.u32 %v560_v50, %v453_v49  ;;  %v506_v59 = vor.u32 %v571_v51, %v503_v52 }
  0x1c   :  { %v431_v60 = vld [vmem:[#allocation5 + $0x18] sm:$0xf0]  ;;  %v445_v61 = vld [vmem:[#allocation5 + $0x30] sm:$0xf]  ;;  %v558_v62 = vld [vmem:[#allocation5 + $0x34] sm:$0xf0]  ;;  %v518_v1 = vor.u32 %v576_v55, %v517_v54 }
  0x1d   :  { %306 = vmatpush.bf16.msra.mxu2 %v458_v28  ;;  %v569_v63 = vld [vmem:[#allocation5 + $0x94] sm:$0xf]  ;;  %v495_v0 = vld [vmem:[#allocation5 + $0x98] sm:$0xf0]  ;;  %v509_v2 = vld [vmem:[#allocation5 + $0xb0] sm:$0xf]  ;;  %v434_v4 = vor.u32 %v553_v57, %v431_v60  ;;  %v446_v6 = vor.u32 %v558_v62, %v445_v61 }
  0x1e   :  { %320 = vmatpush.bf16.msra.mxu3 %v522_v31  ;;  %277 = vmatpush.bf16.msra.mxu0 %v462_v48  ;;  %v574_v3 = vld [vmem:[#allocation5 + $0xb4] sm:$0xf0]  ;;  %v551_v5 = vld [vmem:[#allocation5 + $0x4] sm:$0xf]  ;;  %v498_v7 = vor.u32 %v569_v63, %v495_v0  ;;  %v423_v8 = vld [vmem:[#allocation5 + $0x8] sm:$0xf0] }
  0x1f   :  { %291 = vmatpush.bf16.msra.mxu1 %v526_v53  ;;  %v437_v9 = vld [vmem:[#allocation5 + $0x20] sm:$0xf]  ;;  %v556_v10 = vld [vmem:[#allocation5 + $0x24] sm:$0xf0]  ;;  %v567_v11 = vld [vmem:[#allocation5 + $0x84] sm:$0xf]  ;;  %v510_v13 = vor.u32 %v574_v3, %v509_v2  ;;  %v426_v16 = vor.u32 %v551_v5, %v423_v8 }
  0x20   :  { %v487_v12 = vld [vmem:[#allocation5 + $0x88] sm:$0xf0]  ;;  %v501_v14 = vld [vmem:[#allocation5 + $0xa0] sm:$0xf]  ;;  %v572_v15 = vld [vmem:[#allocation5 + $0xa4] sm:$0xf0]  ;;  %v438_v20 = vor.u32 %v556_v10, %v437_v9 }
  0x21   :  { %307 = vmatpush.bf16.msra.mxu2 %v450_v42  ;;  %v413_v17 = vld [vmem:[#allocation2] sm:$0xf]  ;;  %v550_v18 = vld [vmem:[#allocation2 + $0x4] sm:$0xf0]  ;;  %v549_v19 = vld [vmem:[#allocation2 + $0x4] sm:$0xf]  ;;  %v490_v21 = vor.u32 %v567_v11, %v487_v12  ;;  %v502_v25 = vor.u32 %v572_v15, %v501_v14 }
  0x22   :  { %321 = vmatpush.bf16.msra.mxu3 %v514_v46  ;;  %278 = vmatpush.bf16.msra.mxu0 %v454_v58  ;;  %v415_v22 = vld [vmem:[#allocation2 + $0x8] sm:$0xf0]  ;;  %v429_v23 = vld [vmem:[#allocation5 + $0x10] sm:$0xf]  ;;  %v554_v24 = vld [vmem:[#allocation5 + $0x14] sm:$0xf0]  ;;  %v414_v26 = vor.u32 %v550_v18, %v413_v17 }
  0x23   :  { %292 = vmatpush.bf16.msra.mxu1 %v518_v1  ;;  %v493_v27 = vld [vmem:[#allocation5 + $0x90] sm:$0xf]  ;;  %v570_v28 = vld [vmem:[#allocation5 + $0x94] sm:$0xf0]  ;;  %v418_v29 = vor.u32 %v549_v19, %v415_v22  ;;  %v430_v30 = vor.u32 %v554_v24, %v429_v23  ;;  %v421_v31 = vld [vmem:[#allocation5] sm:$0xf] }
  0x24   :  { %v552_v32 = vld [vmem:[#allocation5 + $0x4] sm:$0xf0]  ;;  %v494_v33 = vor.u32 %v570_v28, %v493_v27  ;;  %v485_v34 = vld [vmem:[#allocation5 + $0x80] sm:$0xf]  ;;  %v705_v54 = vmov -1e+30  }
  0x25   :  { %308 = vmatpush.bf16.msra.mxu2 %v442_v56  ;;  %v568_v35 = vld [vmem:[#allocation5 + $0x84] sm:$0xf0]  ;;  %v422_v36 = vor.u32 %v552_v32, %v421_v31  ;;  %v99_v38 = vld [vmem:[#allocation7] sm:$0x3]  ;;  %64 = vst [vmem:[#allocation8] sm:$0x3] %v705_v54 }
  0x26   :  { %322 = vmatpush.bf16.msra.mxu3 %v506_v59  ;;  %279 = vmatpush.bf16.msra.mxu0 %v446_v6  ;;  %v486_v37 = vor.u32 %v568_v35, %v485_v34  ;;  %v102_v39 = vperm.slane %v99_v38, 1  ;;  %v101_v52 = vperm.slane %v99_v38, 0  ;;  %vm388_vm8 = vcmask 1041409   ;;  %s706_s0 = smov [#allocation8]   ;;  %s400_s30 = sshll.u32 %s742_s3, 4  ;;  %s401_s30 = int_to_ptr.hbm [resolvable:$true] %s400_s30 }
  0x27   :  { %293 = vmatpush.bf16.msra.mxu1 %v510_v13  ;;  %s398_s2 = sshll.u32 %s706_s0, 4  ;;  %s399_s2 = int_to_ptr.vmem [resolvable:$true] %s398_s2 }
  0x29   :  { %309 = vmatpush.bf16.msra.mxu2 %v434_v4 }
  0x2a   :  { %323 = vmatpush.bf16.msra.mxu3 %v498_v7  ;;  %280 = vmatpush.bf16.msra.mxu0 %v438_v20 }
  0x2b   :  { %294 = vmatpush.bf16.msra.mxu1 %v502_v25 }
  0x2d   :  { %310 = vmatpush.bf16.msra.mxu2 %v426_v16 }
  0x2e   :  { %324 = vmatpush.bf16.msra.mxu3 %v490_v21  ;;  %281 = vmatpush.bf16.msra.mxu0 %v430_v30 }
  0x2f   :  { %295 = vmatpush.bf16.msra.mxu1 %v494_v33 }
  0x30   :  { %311 = vmatmul.bf16.vlgmr.msra.gmra.mxu2 %v414_v26 }
  0x31   :  { %325 = vmatmul.bf16.vlgmr.msra.gmra.mxu3 %v418_v29 }
  0x32   :  { %282 = vmatpush.bf16.msra.mxu0 %v422_v36  ;;  %v373_v36 = vld [vmem:[#allocation8] sm:$0x3] }
  0x33   :  { %296 = vmatpush.bf16.msra.mxu1 %v486_v37 }
  0x35   :  { %283 = vmatmul.bf16.vlgmr.msra.gmra.mxu0 %v414_v26 }
  0x36   :  { %297 = vmatmul.bf16.vlgmr.msra.gmra.mxu1 %v418_v29 }
  0xb2   :  { %v284_v53 = vpop.f32.mrf.mxu0 }
  0xb3   :  { %v312_v40 = vpop.f32.mrf.mxu2  ;;  %v285_v56 = vadd.f32 %v284_v53, %v101_v52  ;;  %v298_v57 = vpop.f32.mrf.mxu1 }
  0xb4   :  { %v313_v41 = vadd.f32 %v312_v40, %v102_v39  ;;  %v326_v42 = vpop.f32.mrf.mxu3 }
  0xb5   :  { %v299_v61 = vadd.f32 %v298_v57, %v285_v56 }
  0xb6   :  { %v327_v43 = vadd.f32 %v326_v42, %v313_v41 }
  0xb7   :  { %v331_v3 = vmax.f32 %v299_v61, 0.0 }
  0xb8   :  { %v547_v44 = vmul.f32 -1.442695, %v327_v43 }
  0xba   :  { %590 = vpow2.f32 %v547_v44  ;;  %v286_v2 = vpop.f32.mrf.mxu0 }
  0xbb   :  { %v314_v45 = vpop.f32.mrf.mxu2  ;;  %v287_v7 = vadd.f32 %v286_v2, %v101_v52  ;;  %v300_v9 = vpop.f32.mrf.mxu1 }
  0xbc   :  { %v315_v46 = vadd.f32 %v314_v45, %v102_v39  ;;  %v328_v47 = vpop.f32.mrf.mxu3 }
  0xbd   :  { %v301_v14 = vadd.f32 %v300_v9, %v287_v7 }
  0xbe   :  { %v329_v48 = vadd.f32 %v328_v47, %v315_v46 }
  0xbf   :  { %v332_v22 = vmax.f32 %v301_v14, 0.0 }
  0xc0   :  { %v591_v49 = vpop.eup %590  ;;  %v548_v50 = vmul.f32 -1.442695, %v329_v48 }
  0xc1   :  { %v339_v51 = vadd.f32 1.0, %v591_v49 }
  0xc2   :  { %592 = vpow2.f32 %v548_v50 }
  0xc3   :  { %594 = vrcp.f32 %v339_v51  ;;  %v352_v63 = vand.u32 2147483648, %v339_v51  ;;  %v350_v1 = vand.u32 2147483647, %v339_v51  ;;  %vm346_vm1 = vweird.f32 %v339_v51 }
  0xc5   :  { %v353_v6 = vor.u32 1.1754944e-38, %v352_v63  ;;  %vm351_vm3 = vcmp.eq.f32.partialorder %v350_v1, 8.507059e+37 }
  0xc8   :  { %v593_v55 = vpop.eup %592 }
  0xc9   :  { %v595_v58 = vpop.eup %594  ;;  %v340_v59 = vadd.f32 1.0, %v593_v55 }
  0xca   :  { %v342_v60 = vmul.f32 %v595_v58, %v339_v51  ;;  %vm347_vm0 = vweird.f32 %v595_v58 }
  0xcb   :  { %596 = vrcp.f32 %v340_v59  ;;  %vm348_vm2 = vmor %vm346_vm1, %vm347_vm0  ;;  %v367_v15 = vand.u32 2147483648, %v340_v59  ;;  %v365_v18 = vand.u32 2147483647, %v340_v59  ;;  %vm361_vm5 = vweird.f32 %v340_v59 }
  0xcc   :  { %v343_v62 = vsub.f32 1.0, %v342_v60 }
  0xcd   :  { %v368_v21 = vor.u32 1.1754944e-38, %v367_v15  ;;  %vm366_vm7 = vcmp.eq.f32.partialorder %v365_v18, 8.507059e+37 }
  0xce   :  { %v344_v0 = vmul.f32 %v595_v58, %v343_v62 }
  0xd0   :  { %v345_v4 = vadd.f32 %v595_v58, %v344_v0 }
  0xd1   :  { %v597_v5 = vpop.eup %596 }
  0xd2   :  { %v349_v8 = vsel %vm348_vm2, %v595_v58, %v345_v4  ;;  %v357_v10 = vmul.f32 %v597_v5, %v340_v59  ;;  %vm362_vm4 = vweird.f32 %v597_v5 }
  0xd3   :  { %v354_v11 = vsel %vm351_vm3, %v353_v6, %v349_v8  ;;  %vm363_vm6 = vmor %vm361_vm5, %vm362_vm4 }
  0xd4   :  { %v371_v12 = vmul.f32 %v354_v11, %v331_v3  ;;  %v358_v13 = vsub.f32 1.0, %v357_v10 }
  0xd6   :  { %v374_v16 = vrot.slane %v371_v12, 4  ;;  %v359_v17 = vmul.f32 %v597_v5, %v358_v13 }
  0xd8   :  { %v375_v19 = vmax.f32 %v371_v12, %v374_v16  ;;  %v360_v20 = vadd.f32 %v597_v5, %v359_v17 }
  0xda   :  { %v364_v23 = vsel %vm363_vm6, %v597_v5, %v360_v20  ;;  %v376_v25 = vrot.slane %v375_v19, 2 }
  0xdb   :  { %v369_v24 = vsel %vm366_vm7, %v368_v21, %v364_v23 }
  0xdc   :  { %v372_v26 = vmul.f32 %v369_v24, %v332_v22  ;;  %v377_v28 = vmax.f32 %v375_v19, %v376_v25 }
  0xde   :  { %v380_v27 = vrot.slane %v372_v26, 4  ;;  %v378_v31 = vrot.slane %v377_v28, 1 }
  0xe0   :  { %v381_v29 = vmax.f32 %v372_v26, %v380_v27  ;;  %v379_v34 = vmax.f32 %v377_v28, %v378_v31 }
  0xe2   :  { %v382_v30 = vrot.slane %v381_v29, 2 }
  0xe4   :  { %v383_v32 = vmax.f32 %v381_v29, %v382_v30 }
  0xe6   :  { %v384_v33 = vrot.slane %v383_v32, 1 }
  0xe8   :  { %v385_v35 = vmax.f32 %v383_v32, %v384_v33 }
  0xea   :  { %v389_v37 = vsel %vm388_vm8, %v385_v35, %v379_v34 }
  0xeb   :  { %v391_v38 = vmax.f32 %v373_v36, %v389_v37 }
  0xed   :  { %392 = vst [vmem:[#allocation8] sm:$0x3] %v391_v38 }
  0xee   :  { %403 = dma.vmem_to_hbm [thread:$0]  %s399_s2, 32, %s401_s30, [#allocation4]  }
  0xef   :  { %698 = dma.done.wait [#allocation4], 32  }
  0xf0   :  { %699 = vsyncadd [#allocation4], 4294967264 }
  0xf1   :  { %408 = vsyncpa [#allocation3], 1 }
  0xf2   :  { %409 = vsyncpa [#allocation6], 1 }
  0xf3   :  { %410 = vsyncpa [#allocation4], 1 }

</bundles_post_ra>
